<compile_context>
chip_gen: v7x
topology: tpu7x:2x2x1
jax: 0.10.0
libtpu: 0.0.40
codegen_flags: <defaults>
</compile_context>

<pallas_src>
import numpy as np
import jax
import jax.numpy as jnp
from jax.experimental import pallas as pl
from jax.experimental.pallas import tpu as pltpu

F32 = jnp.float32


# ----------------------------- shared in-kernel math -----------------------------

def _lstm_body(gates, h, c):
    # torch.nn.LSTMCell gate order: i, f, g, o
    H = h.shape[1]
    i_g = jax.nn.sigmoid(gates[:, 0 * H:1 * H])
    f_g = jax.nn.sigmoid(gates[:, 1 * H:2 * H])
    g_g = jnp.tanh(gates[:, 2 * H:3 * H])
    o_g = jax.nn.sigmoid(gates[:, 3 * H:4 * H])
    c_new = f_g * c + i_g * g_g
    h_new = o_g * jnp.tanh(c_new)
    return h_new, c_new


def _mlp_body(x, w1, b1, w2, b2, leaky):
    h = jnp.dot(x, w1, preferred_element_type=F32) + b1
    h = jnp.where(h >= 0.0, h, 0.01 * h) if leaky else jnp.maximum(h, 0.0)
    return jnp.dot(h, w2, preferred_element_type=F32) + b2


# ----------------------------- fused BiLSTM layer kernel -----------------------------
# grid = (direction, time); weights indexed by direction only; h/c in persistent VMEM scratch.

def _bilstm_kernel(x_ref, m_ref, wih_ref, whh_ref, b_ref, out_ref, h_s, c_s):
    t = pl.program_id(1)

    @pl.when(t == 0)
    def _():
        h_s[...] = jnp.zeros_like(h_s)
        c_s[...] = jnp.zeros_like(c_s)

    x = x_ref[0]                      # (B, Din)
    h = h_s[...]
    c = c_s[...]
    gates = (jnp.dot(x, wih_ref[0], preferred_element_type=F32)
             + jnp.dot(h, whh_ref[0], preferred_element_type=F32)
             + b_ref[0])
    h_new, c_new = _lstm_body(gates, h, c)
    valid = m_ref[0] > 0.0            # (B, 1)  packed-sequence masking
    h_s[...] = jnp.where(valid, h_new, h)
    c_s[...] = jnp.where(valid, c_new, c)
    out_ref[0, 0] = jnp.where(valid, h_new, 0.0)


def pallas_bilstm_layer(x_tbd, lengths, layer):
    T, B, Din = x_tbd.shape
    H = layer['fwd']['whh_t'].shape[0]
    wih = jnp.stack([layer['fwd']['wih_t'], layer['bwd']['wih_t']])   # (2, Din, 4H)
    whh = jnp.stack([layer['fwd']['whh_t'], layer['bwd']['whh_t']])   # (2, H, 4H)
    b = jnp.stack([layer['fwd']['b'], layer['bwd']['b']])             # (2, 1, 4H)
    mask = (jnp.arange(T, dtype=jnp.int32)[:, None]
            < jnp.asarray(np.asarray(lengths), jnp.int32)[None, :]
            ).astype(F32)[:, :, None]                                 # (T, B, 1)

    def tmap(d, t):
        # forward: t ; backward: T-1-t  (reads/writes reversed time order)
        return d * (T - 1) + (1 - 2 * d) * t

    out = pl.pallas_call(
        _bilstm_kernel,
        out_shape=jax.ShapeDtypeStruct((2, T, B, H), F32),
        grid=(2, T),
        in_specs=[
            pl.BlockSpec((1, B, Din), lambda d, t: (tmap(d, t), 0, 0)),
            pl.BlockSpec((1, B, 1), lambda d, t: (tmap(d, t), 0, 0)),
            pl.BlockSpec((1, Din, 4 * H), lambda d, t: (d, 0, 0)),
            pl.BlockSpec((1, H, 4 * H), lambda d, t: (d, 0, 0)),
            pl.BlockSpec((1, 1, 4 * H), lambda d, t: (d, 0, 0)),
        ],
        out_specs=pl.BlockSpec((1, 1, B, H), lambda d, t: (d, tmap(d, t), 0, 0)),
        scratch_shapes=[pltpu.VMEM((B, H), F32), pltpu.VMEM((B, H), F32)],
        compiler_params=pltpu.CompilerParams(
            dimension_semantics=("parallel", "arbitrary")),
    )(x_tbd, mask, wih, whh, b)
    return jnp.concatenate([out[0], out[1]], axis=2)                  # (T, B, 2H)


# ----------------------------- key projection MLP kernel -----------------------------

def _mlp_relu_kernel(x_ref, w1_ref, b1_ref, w2_ref, b2_ref, o_ref):
    h = jnp.dot(x_ref[...], w1_ref[...], preferred_element_type=F32) + b1_ref[...]
    h = jnp.maximum(h, 0.0)                                           # nn.ReLU
    o_ref[...] = jnp.dot(h, w2_ref[...], preferred_element_type=F32) + b2_ref[...]


def pallas_mlp_relu(x, w1_t, b1, w2_t, b2):
    M = x.shape[0]
    O = w2_t.shape[1]
    return pl.pallas_call(
        _mlp_relu_kernel,
        out_shape=jax.ShapeDtypeStruct((M, O), F32),
    )(x, w1_t, b1, w2_t, b2)


# ----------------------------- fused decoder kernel -----------------------------
# grid = (decode step,). keys/values/mask/weights resident; states/context/fed-back token in scratch.

def _make_decoder_kernel(B, U, K, V, D, Vc, eval_mode):

    def _attend(query, keys, values, mask):
        # compute_context(): bmm, masked softmax over U, re-mask, L1 renorm, bmm with values.
        q3 = query[:, None, :]                                        # (B, 1, K)
        s = jnp.einsum('bqk,buk->bqu', q3, keys,
                       preferred_element_type=F32)[:, 0, :]           # (B, U) lane-dense
        sm = s * mask
        e = jnp.exp(sm - jnp.max(sm, axis=1, keepdims=True))
        pre = e * pl.reciprocal(jnp.sum(e, axis=1, keepdims=True), approx=True)
        mp = pre * mask
        den = jnp.maximum(jnp.sum(jnp.abs(mp), axis=1, keepdims=True), 1e-12)
        alpha = mp * pl.reciprocal(den, approx=True)
        ctx = jnp.einsum('bqu,buv->bqv', alpha[:, None, :], values,
                         preferred_element_type=F32)[:, 0, :]         # (B, V)
        return ctx

    def kernel(y1h_ref, cond_ref, gmb_ref,
               keys_ref, values_ref, mask_ref, emb_ref, embT_ref,
               w0ie_ref, w0ic_ref, w0h_ref, bc0_ref,
               w1i_ref, w1h_ref, bc1_ref,
               w2i_ref, w2h_ref, bc2_ref,
               qw1_ref, qb1_ref, qw2_ref, qb2_ref,
               cw1h_ref, cw1c_ref, cb1_ref, cb2_ref,
               logit_ref, greedy_ref, gen_ref,
               h0_s, c0_s, h1_s, c1_s, h2_s, c2_s, ctx_s, pred_s):
        step = pl.program_id(0)
        keys = keys_ref[...]
        values = values_ref[...]
        mask = mask_ref[...]

        @pl.when(step == 0)
        def _():
            h0_s[...] = jnp.zeros_like(h0_s); c0_s[...] = jnp.zeros_like(c0_s)
            h1_s[...] = jnp.zeros_like(h1_s); c1_s[...] = jnp.zeros_like(c1_s)
            h2_s[...] = jnp.zeros_like(h2_s); c2_s[...] = jnp.zeros_like(c2_s)
            iota0 = jax.lax.broadcasted_iota(jnp.int32, (B, Vc), 1)
            pred_s[...] = (iota0 == 0).astype(F32)                    # initial pred_char = 0
            q0 = _mlp_body(jnp.zeros((B, 2 * D), F32),
                           qw1_ref[...], qb1_ref[...], qw2_ref[...], qb2_ref[...], False)
            ctx_s[...] = _attend(q0, keys, values, mask)

        # teacher forcing / feedback token as a one-hot (embedding lookup == one-hot @ emb)
        one_hot_in = cond_ref[0] * y1h_ref[0] + (1.0 - cond_ref[0]) * pred_s[...]
        h_emb = jnp.dot(one_hot_in, emb_ref[...], preferred_element_type=F32)     # (B, D)
        ctx = ctx_s[...]

        # 3 stacked LSTM cells (rnn_input = cat(h_emb, context) realized as split matmuls)
        g0 = (jnp.dot(h_emb, w0ie_ref[...], preferred_element_type=F32)
              + jnp.dot(ctx, w0ic_ref[...], preferred_element_type=F32)
              + jnp.dot(h0_s[...], w0h_ref[...], preferred_element_type=F32)
              + bc0_ref[...])
        h0n, c0n = _lstm_body(g0, h0_s[...], c0_s[...])
        g1 = (jnp.dot(h0n, w1i_ref[...], preferred_element_type=F32)
              + jnp.dot(h1_s[...], w1h_ref[...], preferred_element_type=F32)
              + bc1_ref[...])
        h1n, c1n = _lstm_body(g1, h1_s[...], c1_s[...])
        g2 = (jnp.dot(h1n, w2i_ref[...], preferred_element_type=F32)
              + jnp.dot(h2_s[...], w2h_ref[...], preferred_element_type=F32)
              + bc2_ref[...])
        h2n, c2n = _lstm_body(g2, h2_s[...], c2_s[...])
        h0_s[...] = h0n; c0_s[...] = c0n
        h1_s[...] = h1n; c1_s[...] = c1n
        h2_s[...] = h2n; c2_s[...] = c2n

        # query projection + attention
        query = _mlp_body(h2n, qw1_ref[...], qb1_ref[...], qw2_ref[...], qb2_ref[...], False)
        new_ctx = _attend(query, keys, values, mask)
        ctx_s[...] = new_ctx

        # char projection (Linear -> LeakyReLU -> Linear tied to embedding)
        hmid = (jnp.dot(h2n, cw1h_ref[...], preferred_element_type=F32)
                + jnp.dot(new_ctx, cw1c_ref[...], preferred_element_type=F32)
                + cb1_ref[...])
        hmid = jnp.where(hmid >= 0.0, hmid, 0.01 * hmid)
        logit = jnp.dot(hmid, embT_ref[...], preferred_element_type=F32) + cb2_ref[...]
        logit_ref[0] = logit

        # greedy + gumbel argmax (first-max index like torch.max)
        iota_i = jax.lax.broadcasted_iota(jnp.int32, (B, Vc), 1)
        iota_f = iota_i.astype(F32)
        mx = jnp.max(logit, axis=1, keepdims=True)
        greedy = jnp.min(jnp.where(logit == mx, iota_f, 1e9),
                         axis=1, keepdims=True).astype(jnp.int32)     # (B, 1)
        pert = logit + gmb_ref[0]
        mx2 = jnp.max(pert, axis=1, keepdims=True)
        rand = jnp.min(jnp.where(pert == mx2, iota_f, 1e9),
                       axis=1, keepdims=True).astype(jnp.int32)       # (B, 1)
        greedy_ref[0] = greedy
        gen_ref[0] = rand
        chosen = greedy if eval_mode else rand                        # static python branch
        pred_s[...] = (iota_i == chosen).astype(F32)

    return kernel


def _resident_spec(arr):
    zeros = (0,) * arr.ndim

    def imap(i):
        return zeros

    return pl.BlockSpec(arr.shape, imap)


def decoder_forward(params, input_y, keys_, values, max_label_length, feature_lengths,
                    args, rng, eval_mode=False):
    B, U, K = keys_.shape
    V = values.shape[2]
    D = args['decoder_dim']
    Vc = params['embedding'].shape[0]
    max_feature_length = int(np.max(np.asarray(feature_lengths)))
    length = max_feature_length if max_label_length is None else int(max_label_length)
    if max_label_length is not None and max_feature_length < int(max_label_length):
        print('features length: {} smaller that label length: {}'.format(
            max_feature_length, int(max_label_length)))

    mask = (jnp.arange(U, dtype=jnp.int32)[None, :]
            < jnp.asarray(np.asarray(feature_lengths), jnp.int32)[:, None]).astype(F32)   # (B, U)

    rng, kb, kg = jax.random.split(rng, 3)
    if input_y is not None:
        y = jnp.asarray(input_y, jnp.int32)
        assert y.shape[1] >= length, "label tensor narrower than decode length"
        y1h = jax.nn.one_hot(jnp.transpose(y[:, :length]), Vc, dtype=F32)   # (length, B, Vc)
        cond = jax.random.bernoulli(kb, 1.0 - args['net_out_prob'],
                                    (length, B, 1)).astype(F32)
    else:
        y1h = jnp.zeros((length, B, Vc), F32)
        cond = jnp.zeros((length, B, 1), F32)
    eps = 1e-10
    u = jax.random.uniform(kg, (length, B, Vc), F32)
    gumbel = -jnp.log(eps - jnp.log(u + eps))

    emb = params['embedding']                       # (Vc, D)
    embT = jnp.transpose(emb)                       # (D, Vc)  tied char-proj output weight
    c0 = params['dec_cell0']; c1 = params['dec_cell1']; c2 = params['dec_cell2']
    w0ie = c0['wih_t'][:D]                          # (D, 4D)  embedding part of rnn_input
    w0ic = c0['wih_t'][D:]                          # (V, 4D)  context part of rnn_input
    qp = params['query_proj']; cp = params['char_proj']
    cw1h = cp['w1_t'][:2 * D]                       # (2D, D)
    cw1c = cp['w1_t'][2 * D:]                       # (V, D)

    kernel = _make_decoder_kernel(B, U, K, V, D, Vc, eval_mode)

    per_step_specs = [
        pl.BlockSpec((1, B, Vc), lambda i: (i, 0, 0)),
        pl.BlockSpec((1, B, 1), lambda i: (i, 0, 0)),
        pl.BlockSpec((1, B, Vc), lambda i: (i, 0, 0)),
    ]
    resident = [keys_, values, mask, emb, embT,
                w0ie, w0ic, c0['whh_t'], c0['b'],
                c1['wih_t'], c1['whh_t'], c1['b'],
                c2['wih_t'], c2['whh_t'], c2['b'],
                qp['w1_t'], qp['b1'], qp['w2_t'], qp['b2'],
                cw1h, cw1c, cp['b1'], cp['b2']]
    in_specs = per_step_specs + [_resident_spec(a) for a in resident]

    logits, greedys, gens = pl.pallas_call(
        kernel,
        out_shape=(jax.ShapeDtypeStruct((length, B, Vc), F32),
                   jax.ShapeDtypeStruct((length, B, 1), jnp.int32),
                   jax.ShapeDtypeStruct((length, B, 1), jnp.int32)),
        grid=(length,),
        in_specs=in_specs,
        out_specs=(pl.BlockSpec((1, B, Vc), lambda i: (i, 0, 0)),
                   pl.BlockSpec((1, B, 1), lambda i: (i, 0, 0)),
                   pl.BlockSpec((1, B, 1), lambda i: (i, 0, 0))),
        scratch_shapes=[pltpu.VMEM((B, D), F32), pltpu.VMEM((B, D), F32),
                        pltpu.VMEM((B, D), F32), pltpu.VMEM((B, D), F32),
                        pltpu.VMEM((B, 2 * D), F32), pltpu.VMEM((B, 2 * D), F32),
                        pltpu.VMEM((B, V), F32), pltpu.VMEM((B, Vc), F32)],
        compiler_params=pltpu.CompilerParams(dimension_semantics=("arbitrary",)),
    )(y1h, cond, gumbel, *resident)

    logits = jnp.transpose(logits, (1, 0, 2))               # (B, length, vocab)
    greedys = jnp.transpose(greedys[:, :, 0], (1, 0))       # (B, length)
    generateds = jnp.transpose(gens[:, :, 0], (1, 0))       # (B, length)
    return logits, generateds, greedys


# ----------------------------- encoder glue -----------------------------

def concate_sequence_jax(x, lengths):
    # pyramid BiLSTM time merge: pairs (0,1),(2,3),... concatenated on the feature axis
    T = x.shape[0]
    T2 = T // 2
    even = x[0:2 * T2:2]
    odd = x[1:2 * T2:2]
    out = jnp.concatenate([even, odd], axis=2)
    return out, np.asarray(lengths) // 2


def encoder_forward(params, utterances, utterance_lengths):
    h = jnp.transpose(utterances, (1, 0, 2)).astype(F32)    # (T, B, D)
    lengths = np.asarray(utterance_lengths)
    # NOTE: sort + pack_padded_sequence replaced by explicit length masks (equivalent result).
    h = pallas_bilstm_layer(h, lengths, params['enc_rnn0'])
    h = pallas_bilstm_layer(h, lengths, params['enc_rnn1'])
    h, lengths = concate_sequence_jax(h, lengths)
    h = pallas_bilstm_layer(h, lengths, params['enc_rnn2'])
    h, lengths = concate_sequence_jax(h, lengths)
    h = pallas_bilstm_layer(h, lengths, params['enc_rnn3'])
    Lmax = int(np.max(lengths))
    h = h[:Lmax]                                            # (L, B, 2E), zeros past length
    values = jnp.transpose(h, (1, 0, 2))                    # (B, L, 2E)
    L, B, D2 = h.shape
    kp = params['key_proj']
    flat = h.reshape(L * B, D2)
    k = pallas_mlp_relu(flat, kp['w1_t'], kp['b1'], kp['w2_t'], kp['b2'])
    keys_ = k.reshape(L, B, -1)
    tmask = (jnp.arange(L)[:, None] < jnp.asarray(lengths)[None, :])[:, :, None]
    keys_ = jnp.where(tmask, keys_, 0.0)                    # nonseq_to_seq zero-fills padding
    keys_ = jnp.transpose(keys_, (1, 0, 2))                 # (B, L, key_dim)
    return keys_, values, lengths


def seq2seq_forward(params, utterances, utterance_lengths, chars, max_label_length,
                    args, rng, eval_mode=False):
    keys_, values, seq_lengths = encoder_forward(params, utterances, utterance_lengths)
    return decoder_forward(params, chars, keys_, values, max_label_length, seq_lengths,
                           args, rng, eval_mode=eval_mode)


# ----------------------------- deterministic parameter init -----------------------------

def init_params(key, args, input_dim, vocab_size):
    keys = jax.random.split(key, 96)
    it = iter(keys)

    def unif(shape, scale):
        return jax.random.uniform(next(it), shape, F32, -scale, scale)

    E = args['encoder_dim']; D = args['decoder_dim']
    K = args['key_dim']; L = args['linear_dim']

    def lstm_dir(in_dim, hid):
        s = 1.0 / np.sqrt(hid)
        return dict(wih_t=jnp.transpose(unif((4 * hid, in_dim), s)),   # (in, 4H) pre-transposed
                    whh_t=jnp.transpose(unif((4 * hid, hid), s)),      # (H, 4H)
                    b=(unif((4 * hid,), s) + unif((4 * hid,), s)).reshape(1, -1))  # b_ih + b_hh

    def bilstm(in_dim, hid):
        return dict(fwd=lstm_dir(in_dim, hid), bwd=lstm_dir(in_dim, hid))

    def linear(in_dim, out_dim):
        s = 1.0 / np.sqrt(in_dim)
        return dict(w_t=jnp.transpose(unif((out_dim, in_dim), s)),     # (in, out)
                    b=unif((out_dim,), s).reshape(1, -1))

    def mlp(in_dim, mid, out_dim):
        l1 = linear(in_dim, mid); l2 = linear(mid, out_dim)
        return dict(w1_t=l1['w_t'], b1=l1['b'], w2_t=l2['w_t'], b2=l2['b'])

    params = {}
    params['enc_rnn0'] = bilstm(input_dim, E)
    params['enc_rnn1'] = bilstm(2 * E, E)
    params['enc_rnn2'] = bilstm(4 * E, E)          # pLSTM (time-concatenated input)
    params['enc_rnn3'] = bilstm(4 * E, E)          # pLSTM
    params['key_proj'] = mlp(2 * E, L, K)

    value_dim = 2 * E
    params['embedding'] = jax.random.normal(next(it), (vocab_size, D), F32)
    params['dec_cell0'] = lstm_dir(D + value_dim, D)
    params['dec_cell1'] = lstm_dir(D, D)
    params['dec_cell2'] = lstm_dir(D, 2 * D)
    params['query_proj'] = mlp(2 * D, L, K)
    cl1 = linear(2 * D + value_dim, D)
    params['char_proj'] = dict(w1_t=cl1['w_t'], b1=cl1['b'],
                               # final layer weight tied to embedding; bias = init_bias-None case
                               b2=unif((vocab_size,), 1.0 / np.sqrt(D)).reshape(1, -1))
    return params


# ----------------------------- main -----------------------------

if __name__ == "__main__":
    args = dict(encoder_dim=8, decoder_dim=8, key_dim=8, linear_dim=16, net_out_prob=0.1)
    input_dim = 6
    vocab_size = 12
    B, T = 2, 16
    max_label_length = 4   # <= encoder output max length (16 -> 8 -> 4) so no warning path

    key = jax.random.PRNGKey(0)
    k_params, k_rng, k_utt, k_chars = jax.random.split(key, 4)

    params = init_params(k_params, args, input_dim, vocab_size)
    utterances = jax.random.normal(k_utt, (B, T, input_dim), F32)
    utterance_lengths = np.array([16, 12], dtype=np.int32)
    chars = jax.random.randint(k_chars, (B, max_label_length), 0, vocab_size, dtype=jnp.int32)

    logits, generateds, greedys = seq2seq_forward(
        params, utterances, utterance_lengths, chars, max_label_length, args,
        rng=k_rng, eval_mode=False)

    jax.block_until_ready((logits, generateds, greedys))
    assert logits.shape == (B, max_label_length, vocab_size)
    assert generateds.shape == (B, max_label_length)
    assert greedys.shape == (B, max_label_length)
    print("KERNEL_OK")
</pallas_src>

<mosaic_0001>
module attributes {stable_mosaic.version = 11 : i64} {
  func.func @_bilstm_kernel(%arg0: i32, %arg1: i32, %arg2: memref<1x2x6xf32, #tpu.memory_space<vmem>>, %arg3: memref<1x2x1xf32, #tpu.memory_space<vmem>>, %arg4: memref<1x6x32xf32, #tpu.memory_space<vmem>>, %arg5: memref<1x8x32xf32, #tpu.memory_space<vmem>>, %arg6: memref<1x1x32xf32, #tpu.memory_space<vmem>>, %arg7: memref<1x1x2x8xf32, #tpu.memory_space<vmem>>, %arg8: memref<2x8xf32, #tpu.memory_space<vmem>>, %arg9: memref<2x8xf32, #tpu.memory_space<vmem>>) attributes {dimension_semantics = [#tpu.dimension_semantics<parallel>, #tpu.dimension_semantics<arbitrary>], iteration_bounds = array<i64: 2, 16>, scalar_prefetch = 0 : i64, scratch_operands = 2 : i64, tpu.core_type = #tpu.core_type<tc>, window_params = [{transform_indices = @transform_0, window_bounds = array<i64: 1, 2, 6>}, {transform_indices = @transform_1, window_bounds = array<i64: 1, 2, 1>}, {transform_indices = @transform_2, window_bounds = array<i64: 1, 6, 32>}, {transform_indices = @transform_3, window_bounds = array<i64: 1, 8, 32>}, {transform_indices = @transform_4, window_bounds = array<i64: 1, 1, 32>}, {transform_indices = @transform_5, window_bounds = array<i64: 1, 1, 2, 8>}]} {
    %c0_i32 = arith.constant 0 : i32
    %0 = arith.cmpi eq, %arg1, %c0_i32 : i32
    %1 = arith.extui %0 : i1 to i32
    %c0_i32_0 = arith.constant 0 : i32
    %2 = arith.cmpi ne, %1, %c0_i32_0 : i32
    scf.if %2 {
      %cst_33 = arith.constant 0.000000e+00 : f32
      %62 = vector.broadcast %cst_33 : f32 to vector<2x8xf32>
      %c0_34 = arith.constant 0 : index
      %c0_35 = arith.constant 0 : index
      %63 = vector.load %arg8[%c0_34, %c0_35] : memref<2x8xf32, #tpu.memory_space<vmem>>, vector<2x8xf32>
      tpu.vector_store %arg8[%c0_34, %c0_35], %62 {strides = array<i32>} : memref<2x8xf32, #tpu.memory_space<vmem>>, vector<2x8xf32>,
      %cst_36 = arith.constant 0.000000e+00 : f32
      %64 = vector.broadcast %cst_36 : f32 to vector<2x8xf32>
      %c0_37 = arith.constant 0 : index
      %c0_38 = arith.constant 0 : index
      %65 = vector.load %arg9[%c0_37, %c0_38] : memref<2x8xf32, #tpu.memory_space<vmem>>, vector<2x8xf32>
      tpu.vector_store %arg9[%c0_37, %c0_38], %64 {strides = array<i32>} : memref<2x8xf32, #tpu.memory_space<vmem>>, vector<2x8xf32>,
    } else {
    }
    %c0 = arith.constant 0 : index
    %c0_1 = arith.constant 0 : index
    %c0_2 = arith.constant 0 : index
    %3 = vector.load %arg2[%c0, %c0_1, %c0_2] : memref<1x2x6xf32, #tpu.memory_space<vmem>>, vector<1x2x6xf32>
    %4 = vector.shape_cast %3 : vector<1x2x6xf32> to vector<2x6xf32>
    %c0_3 = arith.constant 0 : index
    %c0_4 = arith.constant 0 : index
    %5 = vector.load %arg8[%c0_3, %c0_4] : memref<2x8xf32, #tpu.memory_space<vmem>>, vector<2x8xf32>
    %c0_5 = arith.constant 0 : index
    %c0_6 = arith.constant 0 : index
    %6 = vector.load %arg9[%c0_5, %c0_6] : memref<2x8xf32, #tpu.memory_space<vmem>>, vector<2x8xf32>
    %c0_7 = arith.constant 0 : index
    %c0_8 = arith.constant 0 : index
    %c0_9 = arith.constant 0 : index
    %7 = vector.load %arg4[%c0_7, %c0_8, %c0_9] : memref<1x6x32xf32, #tpu.memory_space<vmem>>, vector<1x6x32xf32>
    %8 = vector.shape_cast %7 : vector<1x6x32xf32> to vector<6x32xf32>
    %cst = arith.constant dense<0.000000e+00> : vector<2x32xf32>
    %9 = tpu.matmul %4, %8, %cst {dimension_numbers = #tpu.dot_dimension_numbers<[1], [0], [0], [1], [0, 0, 1, 1], [], []>} : vector<2x6xf32>, vector<6x32xf32>, vector<2x32xf32> -> vector<2x32xf32>
    %c0_10 = arith.constant 0 : index
    %c0_11 = arith.constant 0 : index
    %c0_12 = arith.constant 0 : index
    %10 = vector.load %arg5[%c0_10, %c0_11, %c0_12] : memref<1x8x32xf32, #tpu.memory_space<vmem>>, vector<1x8x32xf32>
    %11 = vector.shape_cast %10 : vector<1x8x32xf32> to vector<8x32xf32>
    %cst_13 = arith.constant dense<0.000000e+00> : vector<2x32xf32>
    %12 = tpu.matmul %5, %11, %cst_13 {dimension_numbers = #tpu.dot_dimension_numbers<[1], [0], [0], [1], [0, 0, 1, 1], [], []>} : vector<2x8xf32>, vector<8x32xf32>, vector<2x32xf32> -> vector<2x32xf32>
    %13 = arith.addf %9, %12 : vector<2x32xf32>
    %c0_14 = arith.constant 0 : index
    %c0_15 = arith.constant 0 : index
    %c0_16 = arith.constant 0 : index
    %14 = vector.load %arg6[%c0_14, %c0_15, %c0_16] : memref<1x1x32xf32, #tpu.memory_space<vmem>>, vector<1x1x32xf32>
    %15 = vector.shape_cast %14 : vector<1x1x32xf32> to vector<1x32xf32>
    %16 = vector.broadcast %15 : vector<1x32xf32> to vector<2x32xf32>
    %17 = arith.addf %13, %16 : vector<2x32xf32>
    %18 = vector.extract_strided_slice %17 {offsets = [0, 0], sizes = [2, 8], strides = [1, 1]} : vector<2x32xf32> to vector<2x8xf32>
    %19 = arith.negf %18 : vector<2x8xf32>
    %20 = math.exp %19 : vector<2x8xf32>
    %cst_17 = arith.constant 1.000000e+00 : f32
    %21 = vector.broadcast %cst_17 : f32 to vector<2x8xf32>
    %22 = arith.addf %21, %20 : vector<2x8xf32>
    %23 = arith.divf %21, %22 : vector<2x8xf32>
    %24 = vector.extract_strided_slice %17 {offsets = [0, 8], sizes = [2, 8], strides = [1, 1]} : vector<2x32xf32> to vector<2x8xf32>
    %25 = arith.negf %24 : vector<2x8xf32>
    %26 = math.exp %25 : vector<2x8xf32>
    %cst_18 = arith.constant 1.000000e+00 : f32
    %27 = vector.broadcast %cst_18 : f32 to vector<2x8xf32>
    %28 = arith.addf %27, %26 : vector<2x8xf32>
    %29 = arith.divf %27, %28 : vector<2x8xf32>
    %30 = vector.extract_strided_slice %17 {offsets = [0, 16], sizes = [2, 8], strides = [1, 1]} : vector<2x32xf32> to vector<2x8xf32>
    %31 = math.tanh %30 : vector<2x8xf32>
    %32 = vector.extract_strided_slice %17 {offsets = [0, 24], sizes = [2, 8], strides = [1, 1]} : vector<2x32xf32> to vector<2x8xf32>
    %33 = arith.negf %32 : vector<2x8xf32>
    %34 = math.exp %33 : vector<2x8xf32>
    %cst_19 = arith.constant 1.000000e+00 : f32
    %35 = vector.broadcast %cst_19 : f32 to vector<2x8xf32>
    %36 = arith.addf %35, %34 : vector<2x8xf32>
    %37 = arith.divf %35, %36 : vector<2x8xf32>
    %38 = arith.mulf %29, %6 : vector<2x8xf32>
    %39 = arith.mulf %23, %31 : vector<2x8xf32>
    %40 = arith.addf %38, %39 : vector<2x8xf32>
    %41 = math.tanh %40 : vector<2x8xf32>
    %42 = arith.mulf %37, %41 : vector<2x8xf32>
    %c0_20 = arith.constant 0 : index
    %c0_21 = arith.constant 0 : index
    %c0_22 = arith.constant 0 : index
    %43 = vector.load %arg3[%c0_20, %c0_21, %c0_22] : memref<1x2x1xf32, #tpu.memory_space<vmem>>, vector<1x2x1xf32>
    %44 = vector.shape_cast %43 : vector<1x2x1xf32> to vector<2x1xf32>
    %cst_23 = arith.constant 0.000000e+00 : f32
    %45 = vector.broadcast %cst_23 : f32 to vector<2x1xf32>
    %46 = arith.cmpf ogt, %44, %45 : vector<2x1xf32>
    %47 = vector.shape_cast %46 : vector<2x1xi1> to vector<2x1xi1>
    %48 = vector.broadcast %47 : vector<2x1xi1> to vector<2x8xi1>
    %49 = arith.select %48, %42, %5 : vector<2x8xi1>, vector<2x8xf32>
    %c0_24 = arith.constant 0 : index
    %c0_25 = arith.constant 0 : index
    %50 = vector.load %arg8[%c0_24, %c0_25] : memref<2x8xf32, #tpu.memory_space<vmem>>, vector<2x8xf32>
    tpu.vector_store %arg8[%c0_24, %c0_25], %49 {strides = array<i32>} : memref<2x8xf32, #tpu.memory_space<vmem>>, vector<2x8xf32>,
    %51 = vector.shape_cast %46 : vector<2x1xi1> to vector<2x1xi1>
    %52 = vector.broadcast %51 : vector<2x1xi1> to vector<2x8xi1>
    %53 = arith.select %52, %40, %6 : vector<2x8xi1>, vector<2x8xf32>
    %c0_26 = arith.constant 0 : index
    %c0_27 = arith.constant 0 : index
    %54 = vector.load %arg9[%c0_26, %c0_27] : memref<2x8xf32, #tpu.memory_space<vmem>>, vector<2x8xf32>
    tpu.vector_store %arg9[%c0_26, %c0_27], %53 {strides = array<i32>} : memref<2x8xf32, #tpu.memory_space<vmem>>, vector<2x8xf32>,
    %cst_28 = arith.constant 0.000000e+00 : f32
    %55 = vector.shape_cast %46 : vector<2x1xi1> to vector<2x1xi1>
    %56 = vector.broadcast %55 : vector<2x1xi1> to vector<2x8xi1>
    %57 = vector.broadcast %cst_28 : f32 to vector<2x8xf32>
    %58 = arith.select %56, %42, %57 : vector<2x8xi1>, vector<2x8xf32>
    %c0_29 = arith.constant 0 : index
    %c0_30 = arith.constant 0 : index
    %c0_31 = arith.constant 0 : index
    %c0_32 = arith.constant 0 : index
    %59 = vector.load %arg7[%c0_29, %c0_30, %c0_31, %c0_32] : memref<1x1x2x8xf32, #tpu.memory_space<vmem>>, vector<1x1x2x8xf32>
    %60 = vector.shape_cast %59 : vector<1x1x2x8xf32> to vector<2x8xf32>
    %61 = vector.shape_cast %58 : vector<2x8xf32> to vector<1x1x2x8xf32>
    tpu.vector_store %arg7[%c0_29, %c0_30, %c0_31, %c0_32], %61 {strides = array<i32>} : memref<1x1x2x8xf32, #tpu.memory_space<vmem>>, vector<1x1x2x8xf32>,
    return
  }
  func.func @transform_0(%arg0: i32, %arg1: i32) -> (i32, i32, i32) {
    %c15_i32 = arith.constant 15 : i32
    %0 = arith.muli %arg0, %c15_i32 : i32
    %c2_i32 = arith.constant 2 : i32
    %1 = arith.muli %c2_i32, %arg0 : i32
    %c1_i32 = arith.constant 1 : i32
    %2 = arith.subi %c1_i32, %1 : i32
    %3 = arith.muli %2, %arg1 : i32
    %4 = arith.addi %0, %3 : i32
    %c0_i32 = arith.constant 0 : i32
    %c0_i32_0 = arith.constant 0 : i32
    %c0_i32_1 = arith.constant 0 : i32
    return %4, %c0_i32, %c0_i32_0 : i32, i32, i32
  }
  func.func @transform_1(%arg0: i32, %arg1: i32) -> (i32, i32, i32) {
    %c15_i32 = arith.constant 15 : i32
    %0 = arith.muli %arg0, %c15_i32 : i32
    %c2_i32 = arith.constant 2 : i32
    %1 = arith.muli %c2_i32, %arg0 : i32
    %c1_i32 = arith.constant 1 : i32
    %2 = arith.subi %c1_i32, %1 : i32
    %3 = arith.muli %2, %arg1 : i32
    %4 = arith.addi %0, %3 : i32
    %c0_i32 = arith.constant 0 : i32
    %c0_i32_0 = arith.constant 0 : i32
    %c0_i32_1 = arith.constant 0 : i32
    return %4, %c0_i32, %c0_i32_0 : i32, i32, i32
  }
  func.func @transform_2(%arg0: i32, %arg1: i32) -> (i32, i32, i32) {
    %c0_i32 = arith.constant 0 : i32
    %c0_i32_0 = arith.constant 0 : i32
    %c0_i32_1 = arith.constant 0 : i32
    return %arg0, %c0_i32, %c0_i32_0 : i32, i32, i32
  }
  func.func @transform_3(%arg0: i32, %arg1: i32) -> (i32, i32, i32) {
    %c0_i32 = arith.constant 0 : i32
    %c0_i32_0 = arith.constant 0 : i32
    %c0_i32_1 = arith.constant 0 : i32
    return %arg0, %c0_i32, %c0_i32_0 : i32, i32, i32
  }
  func.func @transform_4(%arg0: i32, %arg1: i32) -> (i32, i32, i32) {
    %c0_i32 = arith.constant 0 : i32
    %c0_i32_0 = arith.constant 0 : i32
    %c0_i32_1 = arith.constant 0 : i32
    return %arg0, %c0_i32, %c0_i32_0 : i32, i32, i32
  }
  func.func @transform_5(%arg0: i32, %arg1: i32) -> (i32, i32, i32, i32) {
    %c15_i32 = arith.constant 15 : i32
    %0 = arith.muli %arg0, %c15_i32 : i32
    %c2_i32 = arith.constant 2 : i32
    %1 = arith.muli %c2_i32, %arg0 : i32
    %c1_i32 = arith.constant 1 : i32
    %2 = arith.subi %c1_i32, %1 : i32
    %3 = arith.muli %2, %arg1 : i32
    %4 = arith.addi %0, %3 : i32
    %c0_i32 = arith.constant 0 : i32
    %c0_i32_0 = arith.constant 0 : i32
    %c0_i32_1 = arith.constant 0 : i32
    return %arg0, %4, %c0_i32, %c0_i32_0 : i32, i32, i32, i32
  }
}

</mosaic_0001>

<bundles_post_ra>
// kernel: tpu_custom_call.1
= control target key start
LH: loop header
LB: loop body
LE: loop exit
PB: predicated region body
PF: predicated region fallthrough
CT: control target
= control target key end

     0   :  { %s954_s18 = smov 0   ;;  %s956_s19 = smov 0   ;;  %s1037_s0 = inlined_call_operand.vmem [shape: f32[16,2,6], index: 0, kind: input, shape index: {}]   ;;  %s1038_s1 = inlined_call_operand.vmem [shape: f32[16,2,1], index: 1, kind: input, shape index: {}]   ;;  %s1039_s2 = inlined_call_operand.vmem [shape: f32[2,6,32], index: 2, kind: input, shape index: {}]   ;;  %s1040_s3 = inlined_call_operand.vmem [shape: f32[2,8,32], index: 3, kind: input, shape index: {}]   ;;  %s1041_s4 = inlined_call_operand.vmem [shape: f32[2,1,32], index: 4, kind: input, shape index: {}]   ;;  %s1042_s5 = inlined_call_operand.vmem [shape: f32[2,16,2,8], index: 5, kind: output, shape index: {}]  }
   0x1   :  { %s958_s20 = smov 0   ;;  %s960_s21 = smov 0  }
   0x2   :  { %s962_s22 = smov 0  }
   0x3 LB: > { %s24_s23 = sadd.s32 1, %s904_s20  ;;  %s27_s24 = sadd.s32 1, %s908_s21  ;;  %s912_s22 = sphi %s962_s22, %s15_s22   ;;  %s908_s21 = sphi %s960_s21, %s1048_s21   ;;  %s904_s20 = sphi %s958_s20, %s1047_s20   ;;  %s900_s19 = sphi %s956_s19, %s1046_s19   ;;  %s896_s18 = sphi %s954_s18, %s1045_s18  }
   0x4   : > { %p25_p0 = scmp.ge.s32.totalorder %s24_s23, 16  ;;  %p782_p1 = scmp.ge.s32.totalorder %s912_s22, 1 }
   0x5   : > { %p285_p2 = scmp.lt.s32.totalorder %s912_s22, 33 }
   0x6   : > { %s1050_s23 = smov (%p25_p0, %s24_s23), 0  ;;  %s1052_s24 = smov (!%p25_p0, %s27_s24), %s908_s21 }
   0x7   : > { %p286_p3 = pnand %p782_p1, %p285_p2  ;;  %p29_p4 = scmp.ge.s32.totalorder %s1052_s24, 2 }
   0x8   : > { %s345_s25 = smul.u32 (!%p286_p3), 15, %s900_s19  ;;  %s783_s26 = sshll.u32 (!%p286_p3), %s900_s19, 1 }
   0x9   : > { %s1054_s24 = smov (%p29_p4, %s1052_s24), 0  ;;  %289 = sbr.rel (%p286_p3) target bundleno = 743 (0x2e7), region = 40 }
   0xa   : > { %1043 = sst [smem:[#allocation4_spill]] %s1054_s24  ;;  %s347_s27 = ssub.s32 (!%p286_p3), 1, %s783_s26 }
   0xb   : > { %p373_p5 = scmp.lt.s32.totalorder (!%p286_p3), %s900_s19, 1  ;;  %s348_s28 = smul.u32 (!%p286_p3), %s896_s18, %s347_s27 }
   0xc   : > { %p792_p7 = scmp.ne.s32.totalorder (!%p286_p3), %s896_s18, 0 }
   0xd   : > { %s349_s29 = sadd.s32 (!%p286_p3), %s348_s28, %s345_s25 }
   0xe   : > { %p350_p6 = scmp.lt.s32.totalorder (!%p286_p3), %s349_s29, 15 }
  0x10   : > { %s1056_s19 = smov (!%p373_p5, %s900_s19), 1  ;;  %s1058_s29 = smov (!%p350_p6, %s349_s29), 15 }
  0x11   : > { %s787_s30 = sshll.u32 %s1056_s19, 3  ;;  %s383_s14 = scalar_lea.vmem %s1041_s4, %s1056_s19  ;;  %vm406_vm0 = vcmask (!%p792_p7), 58368   ;;  %v914_v0 = vmov (!%p792_p7), 0.0  }
  0x12   : > { %s376_s8 = scalar_lea.vmem %s1039_s2, %s787_s30  ;;  %s380_s11 = scalar_lea.vmem %s1040_s3, %s787_s30  ;;  %407 = vst.msk [vmem:[#allocation2] sm:$0x3] (!%p792_p7), %vm406_vm0, %v914_v0  ;;  %408 = vst.msk [vmem:[#allocation3] sm:$0x3] (!%p792_p7), %vm406_vm0, %v914_v0 }
  0x13   : > { %s790_s15 = sshll.u32 %s1056_s19, 4  ;;  %s784_s16 = sshll.u32 %s1058_s29, 1 }
  0x14   : > { %s394_s17 = sadd.s32 %s790_s15, %s1058_s29  ;;  %s353_s27 = scalar_lea.vmem %s1037_s0, %s784_s16 }
  0x15   : > { %s1007_s6 = scalar_lea.vmem %s1038_s1, %s784_s16  ;;  %s791_s7 = sshll.u32 %s394_s17, 1 }
  0x16   : > { %s1012_s10 = scalar_lea.vmem %s1042_s5, %s791_s7  ;;  %405 = sbr.rel (%p792_p7) target bundleno = 29 (0x1d), region = 44 }
  0x1d PF: > { %v413_v1 = vld [vmem:[%s380_s11] sm:$0xff]  ;;  %vm492_vm1 = vcmask 1045504   ;;  %v915_v3 = vmov 0.0   ;;  %vm414_vm2 = vcmask 64512   ;;  %vm488_vm3 = vcmask 48128   ;;  %s918_s29 = smov 112  }
  0x1e   : > { %v412_v2 = vld [vmem:[%s376_s8] sm:$0x3f]  ;;  %804 = vmatprep.subr.mxu0 %v915_v3  ;;  %809 = vmatprep.subr.mxu1 %v915_v3  ;;  %vm916_vm4 = vmmov 0   ;;  %v917_v13 = vmov 0   ;;  %s919_s8 = smov 8   ;;  %s920_s19 = smov 24  }
  0x1f   : > { %v410_v4 = vld [vmem:[#allocation2] sm:$0x3]  ;;  %805 = vmatpush3.msra.mxu0 %v413_v1  ;;  %806 = vmatprep.mubr.msk.f32.mxu0 %vm916_vm4, %v915_v3  ;;  %v411_v15 = vld [vmem:[#allocation3] sm:$0x3]  ;;  %s921_s11 = smov 16   ;;  %s922_s12 = smov 120  }
  0x20   : > { %v409_v5 = vld [vmem:[%s353_s27] sm:$0x3]  ;;  %810 = vmatpush3.msk.msra.mxu1 %vm492_vm1, %v412_v2  ;;  %811 = vmatprep.mubr.msk.f32.mxu1 %vm916_vm4, %v915_v3  ;;  %s923_s13 = smov 104   ;;  %vm617_vm7 = vcmask 58368  }
  0x21   : > { %807 = vmatmul.mubr.msk.f32.vlgmr.msra.gmra.mrb[0].mxu0 %vm414_vm2, %v410_v4  ;;  %812 = vmatmul.mubr.msk.f32.vlgmr.msra.gmra.mrb[0].mxu1 %vm488_vm3, %v409_v5  ;;  %v796_v8 = vld [vmem:[%s383_s14] ss:$0 sm:$0xff] }
  0x22   : > { %864 = vset.pattern.permute.xlu1 %v917_v13  ;;  %865 = vset.pattern.permute.xlu0 %v917_v13  ;;  %v602_v19 = vld [vmem:[%s1007_s6] sm:$0x3] }
  0x23   : > { %vm603_vm5 = vcmp.gt.f32.partialorder %v602_v19, 0.0 }
  0x24   : > { %v604_v23 = vsel %vm603_vm5, 1, %v917_v13 }
  0xf4   : > { %v484_v6 = vpop.f32.mrb[0].mxu0  ;;  %v562_v7 = vpop.f32.mrb[0].mxu1 }
  0xf5   : > { %v563_v9 = vadd.f32 %v562_v7, %v484_v6  ;;  %v808_v10 = vpop.f32.mrb[1].mxu0  ;;  %v813_v11 = vpop.f32.mrb[1].mxu1 }
  0xf7   : > { %v573_v12 = vadd.f32 %v796_v8, %v563_v9 }
  0xf9   : > { %866 = vtanh.f32 %v573_v12  ;;  %v797_v16 = vmul.f32 -1.442695, %v573_v12 }
  0xfb   : > { %868 = vpow2.f32 %v797_v16 }
 0x103   : > { %v867_v14 = vpop.eup %866 }
 0x104   : > { %587 = vrot.lane.b32.xlu0 %v867_v14, %s918_s29 }
 0x105   : > { %v869_v17 = vpop.eup %868 }
 0x106   : > { %v577_v18 = vadd.f32 1.0, %v869_v17 }
 0x108   : > { %582 = vrot.lane.b32.xlu0 %v411_v15, %s919_s8  ;;  %870 = vrcp.f32 %v577_v18 }
 0x112   : > { %v871_v20 = vpop.eup %870 }
 0x176   : > { %v588_v21 = vpop.permute.xlu0 %587 }
 0x177   : > { %v590_v22 = vmul.f32 %v871_v20, %v588_v21 }
 0x179   : > { %592 = vrot.lane.b32.xlu1 %v590_v22, %s919_s8 }
 0x17a   : > { %v583_v24 = vpop.permute.xlu0 %582 }
 0x17b   : > { %v585_v25 = vmul.f32 %v871_v20, %v583_v24 }
 0x17d   : > { %606 = vperm.xlu1 %864, %v604_v23  }
 0x181   : > { %609 = vrot.lane.b32.xlu1 %v410_v4, %s920_s19 }
 0x1eb   : > { %v593_v26 = vpop.permute.xlu1 %592 }
 0x1ec   : > { %v595_v27 = vadd.f32 %v593_v26, %v585_v25 }
 0x1ee   : > { %872 = vtanh.f32 %v595_v27 }
 0x1f8   : > { %v873_v28 = vpop.eup %872 }
 0x1f9   : > { %598 = vrot.lane.b32.xlu0 %v873_v28, %s921_s11 }
 0x1fc   : > { %v607_v29 = vpop.permute.xlu1 %606 }
 0x1fd   : > { %vm608_vm6 = vcmp.eq.s32.totalorder %v607_v29, 1 }
 0x1fe   : > { %v619_v30 = vsel %vm608_vm6, %v595_v27, %v583_v24 }
 0x1ff   : > { %621 = vrot.lane.b32.xlu1 %v619_v30, %s922_s12 }
 0x200   : > { %v610_v32 = vpop.permute.xlu1 %609 }
 0x26b   : > { %v599_v31 = vpop.permute.xlu0 %598 }
 0x26c   : > { %v601_v33 = vmul.f32 %v871_v20, %v599_v31 }
 0x26e   : > { %v612_v34 = vsel %vm608_vm6, %v601_v33, %v610_v32  ;;  %v625_v36 = vsel %vm608_vm6, %v601_v33, 0.0 }
 0x26f   : > { %614 = vrot.lane.b32.xlu0 %v612_v34, %s923_s13 }
 0x271   : > { %v622_v35 = vpop.permute.xlu1 %621 }
 0x272   : > { %624 = vst.msk [vmem:[#allocation3] sm:$0x3] %vm617_vm7, %v622_v35 }
 0x273   : > { %627 = vrot.lane.b32.xlu0 %v625_v36, %s923_s13 }
 0x2e1   : > { %v615_v37 = vpop.permute.xlu0 %614 }
 0x2e2   : > { %618 = vst.msk [vmem:[#allocation2] sm:$0x3] %vm617_vm7, %v615_v37 }
 0x2e5   : > { %v628_v38 = vpop.permute.xlu0 %627 }
 0x2e6   : > { %630 = vst.msk [vmem:[%s1012_s10] sm:$0x3] %vm617_vm7, %v628_v38 }
 0x2e7 PF: > { %s15_s22 = sadd.s32 1, %s912_s22   ;;  %s1044_s14 = sld [smem:[#allocation4_spill]] }
 0x2e8   : > { %p12_p8 = scmp.ge.s32.totalorder %s15_s22, 34   ;;  %s1045_s18 = smov %s904_s20 }
 0x2e9   : > { %s1046_s19 = smov %s908_s21  ;;  %s1047_s20 = smov %s1050_s23 }
 0x2ea   :  { %14 = sbr.rel (!%p12_p8) target bundleno = 3 (0x3), region = 86 }
 0x2ed   : > { %s1048_s21 = smov %s1044_s14 }

</bundles_post_ra>
